<compile_context>
chip_gen: v5e
topology: v5e:2x2
jax: 0.10.0
libtpu: 0.0.40
codegen_flags: <defaults>
</compile_context>

<pallas_src>
import functools

import jax
import jax.numpy as jnp
from jax import lax
from jax.experimental import pallas as pl
from jax.experimental.pallas import tpu as pltpu


def _critic_kernel(obs_ref, act_ref,
                   wt_ref, bt_ref, ln_g_ref, ln_b_ref,
                   w1h_ref, w1a_ref, b1a_ref, w1b_ref, b1b_ref, w1c_ref, b1c_ref,
                   w2h_ref, w2a_ref, b2a_ref, w2b_ref, b2b_ref, w2c_ref, b2c_ref,
                   q1_ref, q2_ref, *, eps):
    obs = obs_ref[...]            # (Bt, repr_dim)
    act = act_ref[...]            # (Bt, act_dim)

    # ---- trunk: Linear -> LayerNorm -> Tanh ----
    h = jnp.dot(obs, wt_ref[...], preferred_element_type=jnp.float32) + bt_ref[...]
    mu = jnp.mean(h, axis=-1, keepdims=True)
    centered = h - mu
    var = jnp.mean(centered * centered, axis=-1, keepdims=True)
    h = centered * lax.rsqrt(var + eps)                       # EUP rsqrt
    h = jnp.tanh(h * ln_g_ref[...] + ln_b_ref[...])           # EUP tanh

    # ---- Q head: cat([h, act]) @ W1 == h @ W1_h + act @ W1_a (no concat needed) ----
    def q_head(wh_ref, wa_ref, ba_ref, wb_ref, bb_ref, wc_ref, bc_ref):
        z = (jnp.dot(h, wh_ref[...], preferred_element_type=jnp.float32)
             + jnp.dot(act, wa_ref[...], preferred_element_type=jnp.float32)
             + ba_ref[...])
        z = jnp.maximum(z, 0.0)
        z = jnp.dot(z, wb_ref[...], preferred_element_type=jnp.float32) + bb_ref[...]
        z = jnp.maximum(z, 0.0)
        return jnp.dot(z, wc_ref[...], preferred_element_type=jnp.float32) + bc_ref[...]

    q1_ref[...] = q_head(w1h_ref, w1a_ref, b1a_ref, w1b_ref, b1b_ref,
                         w1c_ref, b1c_ref).astype(q1_ref.dtype)
    q2_ref[...] = q_head(w2h_ref, w2a_ref, b2a_ref, w2b_ref, b2b_ref,
                         w2c_ref, b2c_ref).astype(q2_ref.dtype)


def critic_forward(obs, action, params, *, block_b=8, eps=1e-5):
    """obs: (B, repr_dim) f32, action: (B, act_dim) f32.

    params: dict of pre-transposed weights (in, out) and (1, out) biases:
      wt, bt, ln_g, ln_b,
      w1h, w1a, b1a, w1b, b1b, w1c, b1c,
      w2h, w2a, b2a, w2b, b2b, w2c, b2c
    Returns (q1, q2), each (B, 1).
    """
    b, repr_dim = obs.shape
    _, act_dim = action.shape
    assert b % block_b == 0, "batch must be a multiple of block_b"

    param_order = ["wt", "bt", "ln_g", "ln_b",
                   "w1h", "w1a", "b1a", "w1b", "b1b", "w1c", "b1c",
                   "w2h", "w2a", "b2a", "w2b", "b2b", "w2c", "b2c"]
    param_arrays = [params[k] for k in param_order]

    # Weights/biases: full-array blocks, constant index_map -> resident across grid steps.
    param_specs = [pl.BlockSpec(p.shape, lambda i: (0, 0)) for p in param_arrays]

    kernel = functools.partial(_critic_kernel, eps=eps)
    q1, q2 = pl.pallas_call(
        kernel,
        out_shape=(jax.ShapeDtypeStruct((b, 1), obs.dtype),
                   jax.ShapeDtypeStruct((b, 1), obs.dtype)),
        grid_spec=pltpu.PrefetchScalarGridSpec(
            num_scalar_prefetch=0,
            grid=(b // block_b,),
            in_specs=[pl.BlockSpec((block_b, repr_dim), lambda i: (i, 0)),
                      pl.BlockSpec((block_b, act_dim), lambda i: (i, 0))]
                     + param_specs,
            out_specs=[pl.BlockSpec((block_b, 1), lambda i: (i, 0)),
                       pl.BlockSpec((block_b, 1), lambda i: (i, 0))],
        ),
        compiler_params=pltpu.CompilerParams(
            dimension_semantics=("parallel",)),
    )(obs, action, *param_arrays)
    return q1, q2


def _reference(obs, action, p, eps=1e-5):
    """Pure-JAX reference matching the PyTorch Critic.forward math."""
    h = obs @ p["wt"] + p["bt"]
    mu = h.mean(-1, keepdims=True)
    var = ((h - mu) ** 2).mean(-1, keepdims=True)
    h = (h - mu) / jnp.sqrt(var + eps) * p["ln_g"] + p["ln_b"]
    h = jnp.tanh(h)
    ha = jnp.concatenate([h, action], axis=-1)

    def q_head(pref):
        w1 = jnp.concatenate([p[pref + "h"], p[pref + "a"]], axis=0)
        z = jnp.maximum(ha @ w1 + p[pref[0:2] + "a"], 0.0)
        z = jnp.maximum(z @ p[pref[0:2] + "b"] + p["b" + pref[1] + "b"], 0.0)
        return z @ p[pref[0:2] + "c"] + p["b" + pref[1] + "c"]

    # explicit to avoid key-name confusion
    w1 = jnp.concatenate([p["w1h"], p["w1a"]], axis=0)
    z1 = jnp.maximum(ha @ w1 + p["b1a"], 0.0)
    z1 = jnp.maximum(z1 @ p["w1b"] + p["b1b"], 0.0)
    q1 = z1 @ p["w1c"] + p["b1c"]

    w2 = jnp.concatenate([p["w2h"], p["w2a"]], axis=0)
    z2 = jnp.maximum(ha @ w2 + p["b2a"], 0.0)
    z2 = jnp.maximum(z2 @ p["w2b"] + p["b2b"], 0.0)
    q2 = z2 @ p["w2c"] + p["b2c"]
    return q1, q2


if __name__ == "__main__":
    # Small shapes consistent with Critic(repr_dim, action_shape, feature_dim, hidden_dim)
    batch = 16
    repr_dim, act_dim = 64, 6
    feature_dim, hidden_dim = 32, 32

    key = jax.random.PRNGKey(0)
    keys = jax.random.split(key, 24)

    def rnd(k, shape, scale=0.1):
        return scale * jax.random.normal(k, shape, dtype=jnp.float32)

    obs = jax.random.normal(keys[0], (batch, repr_dim), dtype=jnp.float32)
    action = jax.random.normal(keys[1], (batch, act_dim), dtype=jnp.float32)

    params = {
        # trunk Linear (weights stored (in, out) == PyTorch weight.T) + LayerNorm affine
        "wt":   rnd(keys[2], (repr_dim, feature_dim)),
        "bt":   rnd(keys[3], (1, feature_dim)),
        "ln_g": 1.0 + rnd(keys[4], (1, feature_dim)),
        "ln_b": rnd(keys[5], (1, feature_dim)),
        # Q1: first layer split into h-part / action-part (== concat weight split)
        "w1h":  rnd(keys[6], (feature_dim, hidden_dim)),
        "w1a":  rnd(keys[7], (act_dim, hidden_dim)),
        "b1a":  rnd(keys[8], (1, hidden_dim)),
        "w1b":  rnd(keys[9], (hidden_dim, hidden_dim)),
        "b1b":  rnd(keys[10], (1, hidden_dim)),
        "w1c":  rnd(keys[11], (hidden_dim, 1)),
        "b1c":  rnd(keys[12], (1, 1)),
        # Q2
        "w2h":  rnd(keys[13], (feature_dim, hidden_dim)),
        "w2a":  rnd(keys[14], (act_dim, hidden_dim)),
        "b2a":  rnd(keys[15], (1, hidden_dim)),
        "w2b":  rnd(keys[16], (hidden_dim, hidden_dim)),
        "b2b":  rnd(keys[17], (1, hidden_dim)),
        "w2c":  rnd(keys[18], (hidden_dim, 1)),
        "b2c":  rnd(keys[19], (1, 1)),
    }

    q1, q2 = critic_forward(obs, action, params, block_b=8)
    q1 = jax.block_until_ready(q1)
    q2 = jax.block_until_ready(q2)

    r1, r2 = _reference(obs, action, params)
    assert q1.shape == (batch, 1) and q2.shape == (batch, 1)
    assert jnp.allclose(q1, r1, rtol=1e-5, atol=1e-4), "q1 mismatch vs reference"
    assert jnp.allclose(q2, r2, rtol=1e-5, atol=1e-4), "q2 mismatch vs reference"
    print("KERNEL_OK")
</pallas_src>

<mosaic_0001>
module attributes {stable_mosaic.version = 11 : i64} {
  func.func @_critic_kernel(%arg0: i32, %arg1: memref<8x64xf32, #tpu.memory_space<vmem>>, %arg2: memref<8x6xf32, #tpu.memory_space<vmem>>, %arg3: memref<64x32xf32, #tpu.memory_space<vmem>>, %arg4: memref<1x32xf32, #tpu.memory_space<vmem>>, %arg5: memref<1x32xf32, #tpu.memory_space<vmem>>, %arg6: memref<1x32xf32, #tpu.memory_space<vmem>>, %arg7: memref<32x32xf32, #tpu.memory_space<vmem>>, %arg8: memref<6x32xf32, #tpu.memory_space<vmem>>, %arg9: memref<1x32xf32, #tpu.memory_space<vmem>>, %arg10: memref<32x32xf32, #tpu.memory_space<vmem>>, %arg11: memref<1x32xf32, #tpu.memory_space<vmem>>, %arg12: memref<32x1xf32, #tpu.memory_space<vmem>>, %arg13: memref<1x1xf32, #tpu.memory_space<vmem>>, %arg14: memref<32x32xf32, #tpu.memory_space<vmem>>, %arg15: memref<6x32xf32, #tpu.memory_space<vmem>>, %arg16: memref<1x32xf32, #tpu.memory_space<vmem>>, %arg17: memref<32x32xf32, #tpu.memory_space<vmem>>, %arg18: memref<1x32xf32, #tpu.memory_space<vmem>>, %arg19: memref<32x1xf32, #tpu.memory_space<vmem>>, %arg20: memref<1x1xf32, #tpu.memory_space<vmem>>, %arg21: memref<8x1xf32, #tpu.memory_space<vmem>>, %arg22: memref<8x1xf32, #tpu.memory_space<vmem>>) attributes {dimension_semantics = [#tpu.dimension_semantics<parallel>], iteration_bounds = array<i64: 2>, scalar_prefetch = 0 : i64, scratch_operands = 0 : i64, tpu.core_type = #tpu.core_type<tc>, window_params = [{transform_indices = @transform_0, window_bounds = array<i64: 8, 64>}, {transform_indices = @transform_1, window_bounds = array<i64: 8, 6>}, {pipeline_mode = #tpu.pipeline_mode<synchronous>, transform_indices = @transform_2, window_bounds = array<i64: 64, 32>}, {pipeline_mode = #tpu.pipeline_mode<synchronous>, transform_indices = @transform_3, window_bounds = array<i64: 1, 32>}, {pipeline_mode = #tpu.pipeline_mode<synchronous>, transform_indices = @transform_4, window_bounds = array<i64: 1, 32>}, {pipeline_mode = #tpu.pipeline_mode<synchronous>, transform_indices = @transform_5, window_bounds = array<i64: 1, 32>}, {pipeline_mode = #tpu.pipeline_mode<synchronous>, transform_indices = @transform_6, window_bounds = array<i64: 32, 32>}, {pipeline_mode = #tpu.pipeline_mode<synchronous>, transform_indices = @transform_7, window_bounds = array<i64: 6, 32>}, {pipeline_mode = #tpu.pipeline_mode<synchronous>, transform_indices = @transform_8, window_bounds = array<i64: 1, 32>}, {pipeline_mode = #tpu.pipeline_mode<synchronous>, transform_indices = @transform_9, window_bounds = array<i64: 32, 32>}, {pipeline_mode = #tpu.pipeline_mode<synchronous>, transform_indices = @transform_10, window_bounds = array<i64: 1, 32>}, {pipeline_mode = #tpu.pipeline_mode<synchronous>, transform_indices = @transform_11, window_bounds = array<i64: 32, 1>}, {pipeline_mode = #tpu.pipeline_mode<synchronous>, transform_indices = @transform_12, window_bounds = array<i64: 1, 1>}, {pipeline_mode = #tpu.pipeline_mode<synchronous>, transform_indices = @transform_13, window_bounds = array<i64: 32, 32>}, {pipeline_mode = #tpu.pipeline_mode<synchronous>, transform_indices = @transform_14, window_bounds = array<i64: 6, 32>}, {pipeline_mode = #tpu.pipeline_mode<synchronous>, transform_indices = @transform_15, window_bounds = array<i64: 1, 32>}, {pipeline_mode = #tpu.pipeline_mode<synchronous>, transform_indices = @transform_16, window_bounds = array<i64: 32, 32>}, {pipeline_mode = #tpu.pipeline_mode<synchronous>, transform_indices = @transform_17, window_bounds = array<i64: 1, 32>}, {pipeline_mode = #tpu.pipeline_mode<synchronous>, transform_indices = @transform_18, window_bounds = array<i64: 32, 1>}, {pipeline_mode = #tpu.pipeline_mode<synchronous>, transform_indices = @transform_19, window_bounds = array<i64: 1, 1>}, {transform_indices = @transform_20, window_bounds = array<i64: 8, 1>}, {transform_indices = @transform_21, window_bounds = array<i64: 8, 1>}]} {
    %c0 = arith.constant 0 : index
    %c0_0 = arith.constant 0 : index
    %0 = vector.load %arg1[%c0, %c0_0] : memref<8x64xf32, #tpu.memory_space<vmem>>, vector<8x64xf32>
    %c0_1 = arith.constant 0 : index
    %c0_2 = arith.constant 0 : index
    %1 = vector.load %arg2[%c0_1, %c0_2] : memref<8x6xf32, #tpu.memory_space<vmem>>, vector<8x6xf32>
    %c0_3 = arith.constant 0 : index
    %c0_4 = arith.constant 0 : index
    %2 = vector.load %arg3[%c0_3, %c0_4] : memref<64x32xf32, #tpu.memory_space<vmem>>, vector<64x32xf32>
    %cst = arith.constant dense<0.000000e+00> : vector<8x32xf32>
    %3 = tpu.matmul %0, %2, %cst {dimension_numbers = #tpu.dot_dimension_numbers<[1], [0], [0], [1], [0, 0, 1, 1], [], []>} : vector<8x64xf32>, vector<64x32xf32>, vector<8x32xf32> -> vector<8x32xf32>
    %c0_5 = arith.constant 0 : index
    %c0_6 = arith.constant 0 : index
    %4 = vector.load %arg4[%c0_5, %c0_6] : memref<1x32xf32, #tpu.memory_space<vmem>>, vector<1x32xf32>
    %5 = vector.broadcast %4 : vector<1x32xf32> to vector<8x32xf32>
    %6 = arith.addf %3, %5 : vector<8x32xf32>
    %cst_7 = arith.constant dense<0.000000e+00> : vector<8xf32>
    %7 = vector.multi_reduction <add>, %6, %cst_7 [1] : vector<8x32xf32> to vector<8xf32>
    %8 = vector.shape_cast %7 : vector<8xf32> to vector<8x1xf32>
    %cst_8 = arith.constant 3.200000e+01 : f32
    %9 = vector.broadcast %cst_8 : f32 to vector<8x1xf32>
    %10 = arith.divf %8, %9 : vector<8x1xf32>
    %11 = vector.broadcast %10 : vector<8x1xf32> to vector<8x32xf32>
    %12 = arith.subf %6, %11 : vector<8x32xf32>
    %13 = arith.mulf %12, %12 : vector<8x32xf32>
    %cst_9 = arith.constant dense<0.000000e+00> : vector<8xf32>
    %14 = vector.multi_reduction <add>, %13, %cst_9 [1] : vector<8x32xf32> to vector<8xf32>
    %15 = vector.shape_cast %14 : vector<8xf32> to vector<8x1xf32>
    %cst_10 = arith.constant 3.200000e+01 : f32
    %16 = vector.broadcast %cst_10 : f32 to vector<8x1xf32>
    %17 = arith.divf %15, %16 : vector<8x1xf32>
    %cst_11 = arith.constant 9.99999974E-6 : f32
    %18 = vector.broadcast %cst_11 : f32 to vector<8x1xf32>
    %19 = arith.addf %17, %18 : vector<8x1xf32>
    %20 = math.rsqrt %19 : vector<8x1xf32>
    %21 = vector.broadcast %20 : vector<8x1xf32> to vector<8x32xf32>
    %22 = arith.mulf %12, %21 : vector<8x32xf32>
    %c0_12 = arith.constant 0 : index
    %c0_13 = arith.constant 0 : index
    %23 = vector.load %arg5[%c0_12, %c0_13] : memref<1x32xf32, #tpu.memory_space<vmem>>, vector<1x32xf32>
    %24 = vector.broadcast %23 : vector<1x32xf32> to vector<8x32xf32>
    %25 = arith.mulf %22, %24 : vector<8x32xf32>
    %c0_14 = arith.constant 0 : index
    %c0_15 = arith.constant 0 : index
    %26 = vector.load %arg6[%c0_14, %c0_15] : memref<1x32xf32, #tpu.memory_space<vmem>>, vector<1x32xf32>
    %27 = vector.broadcast %26 : vector<1x32xf32> to vector<8x32xf32>
    %28 = arith.addf %25, %27 : vector<8x32xf32>
    %29 = math.tanh %28 : vector<8x32xf32>
    %c0_16 = arith.constant 0 : index
    %c0_17 = arith.constant 0 : index
    %30 = vector.load %arg7[%c0_16, %c0_17] : memref<32x32xf32, #tpu.memory_space<vmem>>, vector<32x32xf32>
    %cst_18 = arith.constant dense<0.000000e+00> : vector<8x32xf32>
    %31 = tpu.matmul %29, %30, %cst_18 {dimension_numbers = #tpu.dot_dimension_numbers<[1], [0], [0], [1], [0, 0, 1, 1], [], []>} : vector<8x32xf32>, vector<32x32xf32>, vector<8x32xf32> -> vector<8x32xf32>
    %c0_19 = arith.constant 0 : index
    %c0_20 = arith.constant 0 : index
    %32 = vector.load %arg8[%c0_19, %c0_20] : memref<6x32xf32, #tpu.memory_space<vmem>>, vector<6x32xf32>
    %cst_21 = arith.constant dense<0.000000e+00> : vector<8x32xf32>
    %33 = tpu.matmul %1, %32, %cst_21 {dimension_numbers = #tpu.dot_dimension_numbers<[1], [0], [0], [1], [0, 0, 1, 1], [], []>} : vector<8x6xf32>, vector<6x32xf32>, vector<8x32xf32> -> vector<8x32xf32>
    %34 = arith.addf %31, %33 : vector<8x32xf32>
    %c0_22 = arith.constant 0 : index
    %c0_23 = arith.constant 0 : index
    %35 = vector.load %arg9[%c0_22, %c0_23] : memref<1x32xf32, #tpu.memory_space<vmem>>, vector<1x32xf32>
    %36 = vector.broadcast %35 : vector<1x32xf32> to vector<8x32xf32>
    %37 = arith.addf %34, %36 : vector<8x32xf32>
    %cst_24 = arith.constant 0.000000e+00 : f32
    %38 = vector.broadcast %cst_24 : f32 to vector<8x32xf32>
    %39 = arith.maximumf %37, %38 : vector<8x32xf32>
    %c0_25 = arith.constant 0 : index
    %c0_26 = arith.constant 0 : index
    %40 = vector.load %arg10[%c0_25, %c0_26] : memref<32x32xf32, #tpu.memory_space<vmem>>, vector<32x32xf32>
    %cst_27 = arith.constant dense<0.000000e+00> : vector<8x32xf32>
    %41 = tpu.matmul %39, %40, %cst_27 {dimension_numbers = #tpu.dot_dimension_numbers<[1], [0], [0], [1], [0, 0, 1, 1], [], []>} : vector<8x32xf32>, vector<32x32xf32>, vector<8x32xf32> -> vector<8x32xf32>
    %c0_28 = arith.constant 0 : index
    %c0_29 = arith.constant 0 : index
    %42 = vector.load %arg11[%c0_28, %c0_29] : memref<1x32xf32, #tpu.memory_space<vmem>>, vector<1x32xf32>
    %43 = vector.broadcast %42 : vector<1x32xf32> to vector<8x32xf32>
    %44 = arith.addf %41, %43 : vector<8x32xf32>
    %cst_30 = arith.constant 0.000000e+00 : f32
    %45 = vector.broadcast %cst_30 : f32 to vector<8x32xf32>
    %46 = arith.maximumf %44, %45 : vector<8x32xf32>
    %c0_31 = arith.constant 0 : index
    %c0_32 = arith.constant 0 : index
    %47 = vector.load %arg12[%c0_31, %c0_32] : memref<32x1xf32, #tpu.memory_space<vmem>>, vector<32x1xf32>
    %cst_33 = arith.constant dense<0.000000e+00> : vector<8x1xf32>
    %48 = tpu.matmul %46, %47, %cst_33 {dimension_numbers = #tpu.dot_dimension_numbers<[1], [0], [0], [1], [0, 0, 1, 1], [], []>} : vector<8x32xf32>, vector<32x1xf32>, vector<8x1xf32> -> vector<8x1xf32>
    %c0_34 = arith.constant 0 : index
    %c0_35 = arith.constant 0 : index
    %49 = vector.load %arg13[%c0_34, %c0_35] : memref<1x1xf32, #tpu.memory_space<vmem>>, vector<1x1xf32>
    %50 = vector.broadcast %49 : vector<1x1xf32> to vector<8x1xf32>
    %51 = arith.addf %48, %50 : vector<8x1xf32>
    %c0_36 = arith.constant 0 : index
    %c0_37 = arith.constant 0 : index
    %52 = vector.load %arg21[%c0_36, %c0_37] : memref<8x1xf32, #tpu.memory_space<vmem>>, vector<8x1xf32>
    tpu.vector_store %arg21[%c0_36, %c0_37], %51 {strides = array<i32>} : memref<8x1xf32, #tpu.memory_space<vmem>>, vector<8x1xf32>,
    %c0_38 = arith.constant 0 : index
    %c0_39 = arith.constant 0 : index
    %53 = vector.load %arg14[%c0_38, %c0_39] : memref<32x32xf32, #tpu.memory_space<vmem>>, vector<32x32xf32>
    %cst_40 = arith.constant dense<0.000000e+00> : vector<8x32xf32>
    %54 = tpu.matmul %29, %53, %cst_40 {dimension_numbers = #tpu.dot_dimension_numbers<[1], [0], [0], [1], [0, 0, 1, 1], [], []>} : vector<8x32xf32>, vector<32x32xf32>, vector<8x32xf32> -> vector<8x32xf32>
    %c0_41 = arith.constant 0 : index
    %c0_42 = arith.constant 0 : index
    %55 = vector.load %arg15[%c0_41, %c0_42] : memref<6x32xf32, #tpu.memory_space<vmem>>, vector<6x32xf32>
    %cst_43 = arith.constant dense<0.000000e+00> : vector<8x32xf32>
    %56 = tpu.matmul %1, %55, %cst_43 {dimension_numbers = #tpu.dot_dimension_numbers<[1], [0], [0], [1], [0, 0, 1, 1], [], []>} : vector<8x6xf32>, vector<6x32xf32>, vector<8x32xf32> -> vector<8x32xf32>
    %57 = arith.addf %54, %56 : vector<8x32xf32>
    %c0_44 = arith.constant 0 : index
    %c0_45 = arith.constant 0 : index
    %58 = vector.load %arg16[%c0_44, %c0_45] : memref<1x32xf32, #tpu.memory_space<vmem>>, vector<1x32xf32>
    %59 = vector.broadcast %58 : vector<1x32xf32> to vector<8x32xf32>
    %60 = arith.addf %57, %59 : vector<8x32xf32>
    %cst_46 = arith.constant 0.000000e+00 : f32
    %61 = vector.broadcast %cst_46 : f32 to vector<8x32xf32>
    %62 = arith.maximumf %60, %61 : vector<8x32xf32>
    %c0_47 = arith.constant 0 : index
    %c0_48 = arith.constant 0 : index
    %63 = vector.load %arg17[%c0_47, %c0_48] : memref<32x32xf32, #tpu.memory_space<vmem>>, vector<32x32xf32>
    %cst_49 = arith.constant dense<0.000000e+00> : vector<8x32xf32>
    %64 = tpu.matmul %62, %63, %cst_49 {dimension_numbers = #tpu.dot_dimension_numbers<[1], [0], [0], [1], [0, 0, 1, 1], [], []>} : vector<8x32xf32>, vector<32x32xf32>, vector<8x32xf32> -> vector<8x32xf32>
    %c0_50 = arith.constant 0 : index
    %c0_51 = arith.constant 0 : index
    %65 = vector.load %arg18[%c0_50, %c0_51] : memref<1x32xf32, #tpu.memory_space<vmem>>, vector<1x32xf32>
    %66 = vector.broadcast %65 : vector<1x32xf32> to vector<8x32xf32>
    %67 = arith.addf %64, %66 : vector<8x32xf32>
    %cst_52 = arith.constant 0.000000e+00 : f32
    %68 = vector.broadcast %cst_52 : f32 to vector<8x32xf32>
    %69 = arith.maximumf %67, %68 : vector<8x32xf32>
    %c0_53 = arith.constant 0 : index
    %c0_54 = arith.constant 0 : index
    %70 = vector.load %arg19[%c0_53, %c0_54] : memref<32x1xf32, #tpu.memory_space<vmem>>, vector<32x1xf32>
    %cst_55 = arith.constant dense<0.000000e+00> : vector<8x1xf32>
    %71 = tpu.matmul %69, %70, %cst_55 {dimension_numbers = #tpu.dot_dimension_numbers<[1], [0], [0], [1], [0, 0, 1, 1], [], []>} : vector<8x32xf32>, vector<32x1xf32>, vector<8x1xf32> -> vector<8x1xf32>
    %c0_56 = arith.constant 0 : index
    %c0_57 = arith.constant 0 : index
    %72 = vector.load %arg20[%c0_56, %c0_57] : memref<1x1xf32, #tpu.memory_space<vmem>>, vector<1x1xf32>
    %73 = vector.broadcast %72 : vector<1x1xf32> to vector<8x1xf32>
    %74 = arith.addf %71, %73 : vector<8x1xf32>
    %c0_58 = arith.constant 0 : index
    %c0_59 = arith.constant 0 : index
    %75 = vector.load %arg22[%c0_58, %c0_59] : memref<8x1xf32, #tpu.memory_space<vmem>>, vector<8x1xf32>
    tpu.vector_store %arg22[%c0_58, %c0_59], %74 {strides = array<i32>} : memref<8x1xf32, #tpu.memory_space<vmem>>, vector<8x1xf32>,
    return
  }
  func.func @transform_0(%arg0: i32) -> (i32, i32) {
    %c0_i32 = arith.constant 0 : i32
    %c0_i32_0 = arith.constant 0 : i32
    return %arg0, %c0_i32 : i32, i32
  }
  func.func @transform_1(%arg0: i32) -> (i32, i32) {
    %c0_i32 = arith.constant 0 : i32
    %c0_i32_0 = arith.constant 0 : i32
    return %arg0, %c0_i32 : i32, i32
  }
  func.func @transform_2(%arg0: i32) -> (i32, i32) {
    %c0_i32 = arith.constant 0 : i32
    %c0_i32_0 = arith.constant 0 : i32
    %c0_i32_1 = arith.constant 0 : i32
    return %c0_i32, %c0_i32_0 : i32, i32
  }
  func.func @transform_3(%arg0: i32) -> (i32, i32) {
    %c0_i32 = arith.constant 0 : i32
    %c0_i32_0 = arith.constant 0 : i32
    %c0_i32_1 = arith.constant 0 : i32
    return %c0_i32, %c0_i32_0 : i32, i32
  }
  func.func @transform_4(%arg0: i32) -> (i32, i32) {
    %c0_i32 = arith.constant 0 : i32
    %c0_i32_0 = arith.constant 0 : i32
    %c0_i32_1 = arith.constant 0 : i32
    return %c0_i32, %c0_i32_0 : i32, i32
  }
  func.func @transform_5(%arg0: i32) -> (i32, i32) {
    %c0_i32 = arith.constant 0 : i32
    %c0_i32_0 = arith.constant 0 : i32
    %c0_i32_1 = arith.constant 0 : i32
    return %c0_i32, %c0_i32_0 : i32, i32
  }
  func.func @transform_6(%arg0: i32) -> (i32, i32) {
    %c0_i32 = arith.constant 0 : i32
    %c0_i32_0 = arith.constant 0 : i32
    %c0_i32_1 = arith.constant 0 : i32
    return %c0_i32, %c0_i32_0 : i32, i32
  }
  func.func @transform_7(%arg0: i32) -> (i32, i32) {
    %c0_i32 = arith.constant 0 : i32
    %c0_i32_0 = arith.constant 0 : i32
    %c0_i32_1 = arith.constant 0 : i32
    return %c0_i32, %c0_i32_0 : i32, i32
  }
  func.func @transform_8(%arg0: i32) -> (i32, i32) {
    %c0_i32 = arith.constant 0 : i32
    %c0_i32_0 = arith.constant 0 : i32
    %c0_i32_1 = arith.constant 0 : i32
    return %c0_i32, %c0_i32_0 : i32, i32
  }
  func.func @transform_9(%arg0: i32) -> (i32, i32) {
    %c0_i32 = arith.constant 0 : i32
    %c0_i32_0 = arith.constant 0 : i32
    %c0_i32_1 = arith.constant 0 : i32
    return %c0_i32, %c0_i32_0 : i32, i32
  }
  func.func @transform_10(%arg0: i32) -> (i32, i32) {
    %c0_i32 = arith.constant 0 : i32
    %c0_i32_0 = arith.constant 0 : i32
    %c0_i32_1 = arith.constant 0 : i32
    return %c0_i32, %c0_i32_0 : i32, i32
  }
  func.func @transform_11(%arg0: i32) -> (i32, i32) {
    %c0_i32 = arith.constant 0 : i32
    %c0_i32_0 = arith.constant 0 : i32
    %c0_i32_1 = arith.constant 0 : i32
    return %c0_i32, %c0_i32_0 : i32, i32
  }
  func.func @transform_12(%arg0: i32) -> (i32, i32) {
    %c0_i32 = arith.constant 0 : i32
    %c0_i32_0 = arith.constant 0 : i32
    %c0_i32_1 = arith.constant 0 : i32
    return %c0_i32, %c0_i32_0 : i32, i32
  }
  func.func @transform_13(%arg0: i32) -> (i32, i32) {
    %c0_i32 = arith.constant 0 : i32
    %c0_i32_0 = arith.constant 0 : i32
    %c0_i32_1 = arith.constant 0 : i32
    return %c0_i32, %c0_i32_0 : i32, i32
  }
  func.func @transform_14(%arg0: i32) -> (i32, i32) {
    %c0_i32 = arith.constant 0 : i32
    %c0_i32_0 = arith.constant 0 : i32
    %c0_i32_1 = arith.constant 0 : i32
    return %c0_i32, %c0_i32_0 : i32, i32
  }
  func.func @transform_15(%arg0: i32) -> (i32, i32) {
    %c0_i32 = arith.constant 0 : i32
    %c0_i32_0 = arith.constant 0 : i32
    %c0_i32_1 = arith.constant 0 : i32
    return %c0_i32, %c0_i32_0 : i32, i32
  }
  func.func @transform_16(%arg0: i32) -> (i32, i32) {
    %c0_i32 = arith.constant 0 : i32
    %c0_i32_0 = arith.constant 0 : i32
    %c0_i32_1 = arith.constant 0 : i32
    return %c0_i32, %c0_i32_0 : i32, i32
  }
  func.func @transform_17(%arg0: i32) -> (i32, i32) {
    %c0_i32 = arith.constant 0 : i32
    %c0_i32_0 = arith.constant 0 : i32
    %c0_i32_1 = arith.constant 0 : i32
    return %c0_i32, %c0_i32_0 : i32, i32
  }
  func.func @transform_18(%arg0: i32) -> (i32, i32) {
    %c0_i32 = arith.constant 0 : i32
    %c0_i32_0 = arith.constant 0 : i32
    %c0_i32_1 = arith.constant 0 : i32
    return %c0_i32, %c0_i32_0 : i32, i32
  }
  func.func @transform_19(%arg0: i32) -> (i32, i32) {
    %c0_i32 = arith.constant 0 : i32
    %c0_i32_0 = arith.constant 0 : i32
    %c0_i32_1 = arith.constant 0 : i32
    return %c0_i32, %c0_i32_0 : i32, i32
  }
  func.func @transform_20(%arg0: i32) -> (i32, i32) {
    %c0_i32 = arith.constant 0 : i32
    %c0_i32_0 = arith.constant 0 : i32
    return %arg0, %c0_i32 : i32, i32
  }
  func.func @transform_21(%arg0: i32) -> (i32, i32) {
    %c0_i32 = arith.constant 0 : i32
    %c0_i32_0 = arith.constant 0 : i32
    return %arg0, %c0_i32 : i32, i32
  }
}

</mosaic_0001>

<bundles_post_ra>
// kernel: tpu_custom_call.1
= control target key start
LH: loop header
LB: loop body
LE: loop exit
PB: predicated region body
PF: predicated region fallthrough
CT: control target
= control target key end

     0   :  { %s1675_s0 = inlined_call_operand.vmem [shape: f32[16,64], index: 0, kind: input, shape index: {}]   ;;  %s1676_s1 = inlined_call_operand.vmem [shape: f32[16,6], index: 1, kind: input, shape index: {}]   ;;  %s1677_s2 = inlined_call_operand.vmem [shape: f32[64,32], index: 2, kind: input, shape index: {}]   ;;  %s1678_s3 = inlined_call_operand.vmem [shape: f32[1,32], index: 3, kind: input, shape index: {}]   ;;  %s1679_s4 = inlined_call_operand.hbm [shape: f32[1,32], index: 4, kind: input, shape index: {}]   ;;  %s1680_s5 = inlined_call_operand.hbm [shape: f32[1,32], index: 5, kind: input, shape index: {}]   ;;  %s1681_s6 = inlined_call_operand.vmem [shape: f32[32,32], index: 6, kind: input, shape index: {}]   ;;  %s1682_s7 = inlined_call_operand.vmem [shape: f32[6,32], index: 7, kind: input, shape index: {}]   ;;  %s1683_s8 = inlined_call_operand.hbm [shape: f32[1,32], index: 8, kind: input, shape index: {}]   ;;  %s1684_s9 = inlined_call_operand.vmem [shape: f32[32,32], index: 9, kind: input, shape index: {}]   ;;  %s1685_s10 = inlined_call_operand.vmem [shape: f32[1,32], index: 10, kind: input, shape index: {}]   ;;  %s1686_s11 = inlined_call_operand.vmem [shape: f32[32,1], index: 11, kind: input, shape index: {}]   ;;  %s1687_s12 = inlined_call_operand.<no memory space> [shape: f32[1,1], index: 12, kind: input, shape index: {}]   ;;  %s1688_s13 = inlined_call_operand.vmem [shape: f32[32,32], index: 13, kind: input, shape index: {}]   ;;  %s1689_s14 = inlined_call_operand.vmem [shape: f32[6,32], index: 14, kind: input, shape index: {}]   ;;  %s1690_s15 = inlined_call_operand.vmem [shape: f32[1,32], index: 15, kind: input, shape index: {}]   ;;  %s1691_s16 = inlined_call_operand.vmem [shape: f32[32,32], index: 16, kind: input, shape index: {}]   ;;  %s1692_s17 = inlined_call_operand.vmem [shape: f32[1,32], index: 17, kind: input, shape index: {}]   ;;  %s1693_s18 = inlined_call_operand.vmem [shape: f32[32,1], index: 18, kind: input, shape index: {}]   ;;  %s1694_s20 = inlined_call_operand.vmem [shape: f32[16,1], index: 20, kind: output, shape index: {0}]   ;;  %s1695_s21 = inlined_call_operand.vmem [shape: f32[16,1], index: 21, kind: output, shape index: {1}]   ;;  %s1696_s19 = inlined_call_operand.<no memory space> [shape: f32[1,1], index: 19, kind: input, shape index: {}]  }
   0x1   :  { %1698 = sst [smem:[#allocation11_spill]] %s1675_s0  ;;  %v27_v0 = vstv %s1687_s12  ;;  %v29_v1 = vstv %s1696_s19 }
   0x2   :  { %1699 = sst [smem:[#allocation12_spill]] %s1676_s1  ;;  %28 = vst [vmem:[#allocation2] sm:$0x1] %v27_v0 }
   0x3   :  { %1700 = sst [smem:[#allocation13_spill]] %s1677_s2  ;;  %30 = vst [vmem:[#allocation3] sm:$0x1] %v29_v1 }
   0x4   :  { %1701 = sst [smem:[#allocation14_spill]] %s1678_s3 }
   0x5   :  { %1702 = sst [smem:[#allocation15_spill]] %s1679_s4 }
   0x6   :  { %1703 = sst [smem:[#allocation16_spill]] %s1680_s5 }
   0x7   :  { %31 = vsyncpa [#allocation5], 0 }
   0x8   :  { %32 = vsyncpa [#allocation7], 0  ;;  %s1488_s3 = smov 0  }
   0x9 LB: > { %s1704_s0 = sld [smem:[#allocation16_spill]]  ;;  %s1497_s19 = sadd.s32 4294967295, %s1366_s3   ;;  %s1366_s3 = sphi %s1488_s3, %s38_s3  }
   0xa   : > { %p1181_p0 = scmp.ge.s32.totalorder %s1366_s3, 1  ;;  %p525_p1 = scmp.lt.s32.totalorder %s1366_s3, 3 }
   0xb   : > { %p1229_p2 = scmp.eq.s32.totalorder %s1497_s19, 0  ;;  %s1368_s30 = smov [#allocation6]  }
   0xc   : > { %p1502_p3 = pnand %p1181_p0, %p525_p1  ;;  %s557_s5 = sshll.u32 %s1368_s30, 4  ;;  %s558_s5 = int_to_ptr.vmem [resolvable:$true] %s557_s5 }
   0xd   : > { %s1706_s1 = sld [smem:[#allocation15_spill]]  ;;  %s573_s26 = sshll.u32 %s1683_s8, 4  ;;  %s574_s26 = int_to_ptr.hbm [resolvable:$true] %s573_s26 }
   0xe   : > { %p1219_p4 = pneg %p1502_p3  ;;  %s1369_s27 = smov [#allocation4]  }
   0xf   : > { %s555_s12 = sshll.u32 %s1704_s0, 4  ;;  %s545_s28 = sshll.u32 %s1369_s27, 4  ;;  %s556_s12 = int_to_ptr.hbm [resolvable:$true] %s555_s12  ;;  %s546_s28 = int_to_ptr.vmem [resolvable:$true] %s545_s28 }
  0x10   : > { %p1220_p5 = pnand %p1229_p2, %p1219_p4  ;;  %s1370_s29 = smov [#allocation8]  }
  0x11   : > { %s575_s0 = sshll.u32 %s1370_s29, 4  ;;  %635 = sbr.rel (%p1502_p3) target bundleno = 993 (0x3e1), region = 100  ;;  %s576_s0 = int_to_ptr.vmem [resolvable:$true] %s575_s0 }
  0x12   : > { %1225 = dma.hbm_to_vmem [thread:$0]  (!%p1220_p5), %s556_s12, 16, %s558_s5, [#allocation7]  }
  0x13   : > { %s543_s24 = sshll.u32 %s1706_s1, 4  ;;  %s544_s24 = int_to_ptr.hbm [resolvable:$true] %s543_s24 }
  0x14   : > { %1222 = dma.hbm_to_vmem [thread:$0]  (!%p1220_p5), %s544_s24, 16, %s546_s28, [#allocation5]  }
  0x15   : > { %1228 = dma.hbm_to_vmem [thread:$0]  (!%p1220_p5), %s574_s26, 16, %s576_s0, [#allocation7]  }
  0x16   : > { %1357 = dma.done.wait (%p1229_p2), [#allocation5], 16  }
  0x17   : > { %1359 = vsyncadd (%p1229_p2), [#allocation5], 4294967280 }
  0x18   : > { %1361 = dma.done.wait (%p1229_p2), [#allocation7], 32  }
  0x19   : > { %1363 = vsyncadd (%p1229_p2), [#allocation7], 4294967264  ;;  %p712_p6 = scmp.lt.s32.totalorder %s1497_s19, 1  ;;  %s1707_s5 = sld [smem:[#allocation13_spill]]  ;;  %vm742_vm0 = vcmask 523264   ;;  %vm766_vm1 = vcmask 261120  }
  0x1a   : > { %s1708_s22 = sld [smem:[#allocation11_spill]]  ;;  %v1371_v15 = vmov 32.0   ;;  %v810_v27 = vld [vmem:[%s1681_s6 + $0x18] sm:$0xff]  ;;  %v809_v28 = vld [vmem:[%s1681_s6 + $0x10] sm:$0xff]  ;;  %v808_v29 = vld [vmem:[%s1681_s6 + $0x8] sm:$0xff]  ;;  %vm816_vm3 = vcmask 1045504  }
  0x1b   : > { %s1712_s19 = smov (!%p712_p6, %s1497_s19), 1  ;;  %s1709_s25 = sld [smem:[#allocation14_spill]]  ;;  %1256 = vrcp.f32 %v1371_v15  ;;  %855 = vmatpush.msra.mxu2 %v810_v27  ;;  %v807_v31 = vld [vmem:[%s1681_s6] sm:$0xff]  ;;  %vm812_vm4 = vcmask 48128   ;;  %v872_v49 = vld [vmem:[%s1684_s9 + $0x18] sm:$0xff]  ;;  %v871_v50 = vld [vmem:[%s1684_s9 + $0x10] sm:$0xff] }
  0x1c   : > { %s1543_s27 = sshll.u32 %s1712_s19, 3  ;;  %s1710_s24 = sld [smem:[#allocation12_spill]]  ;;  %v811_v34 = vld [vmem:[%s1682_s7] sm:$0x3f]  ;;  %892 = vmatpush.msra.mxu3 %v872_v49  ;;  %v870_v51 = vld [vmem:[%s1684_s9 + $0x8] sm:$0xff]  ;;  %v937_v54 = vld [vmem:[%s1688_s13 + $0x18] sm:$0xff] }
  0x1d   : > { %856 = vmatpush.msra.mxu2 %v809_v28  ;;  %1195 = vmatpush.msk.msra.mxu1 %vm816_vm3, %v811_v34  ;;  %v1248_v42 = vld [vmem:[#allocation4] ss:$0 sm:$0xff]  ;;  %v1249_v44 = vld [vmem:[#allocation6] ss:$0 sm:$0xff]  ;;  %v936_v55 = vld [vmem:[%s1688_s13 + $0x10] sm:$0xff]  ;;  %s723_s4 = scalar_lea.vmem %s1694_s20, %s1543_s27  ;;  %vm932_vm8 = vcmask 7168  }
  0x1e   : > { %893 = vmatpush.msra.mxu3 %v871_v50  ;;  %v869_v52 = vld [vmem:[%s1684_s9] sm:$0xff]  ;;  %v935_v56 = vld [vmem:[%s1688_s13 + $0x8] sm:$0xff]  ;;  %v904_v58 = vld [vmem:[%s1686_s11 + $0x18] sm:$0xff] }
  0x1f   : > { %v737_v2 = vld [vmem:[%s1707_s5 + $0x38] sm:$0xff]  ;;  %v736_v3 = vld [vmem:[%s1707_s5 + $0x30] sm:$0xff]  ;;  %v735_v4 = vld [vmem:[%s1707_s5 + $0x28] sm:$0xff]  ;;  %857 = vmatpush.msra.mxu2 %v808_v29  ;;  %924 = vmatpush.msrb.mxu1 %v904_v58 }
  0x20   : > { %754 = vmatpush.msra.mxu0 %v737_v2  ;;  %v734_v5 = vld [vmem:[%s1707_s5 + $0x20] sm:$0xff]  ;;  %v733_v6 = vld [vmem:[%s1707_s5 + $0x18] sm:$0xff]  ;;  %v732_v7 = vld [vmem:[%s1707_s5 + $0x10] sm:$0xff]  ;;  %s715_s23 = scalar_lea.vmem %s1708_s22, %s1543_s27  ;;  %894 = vmatpush.msra.mxu3 %v870_v51 }
  0x21   : > { %v731_v8 = vld [vmem:[%s1707_s5 + $0x8] sm:$0xff]  ;;  %v730_v9 = vld [vmem:[%s1707_s5] sm:$0xff]  ;;  %v1257_v16 = vpop.eup %1256  ;;  %858 = vmatpush.msra.mxu2 %v807_v31  ;;  %v903_v1 = vld [vmem:[%s1686_s11 + $0x10] sm:$0xff] }
  0x22   : > { %755 = vmatpush.msra.mxu0 %v736_v3  ;;  %v728_v10 = vld [vmem:[%s715_s23] sm:$0xff]  ;;  %v771_v17 = vmul.f32 32.0, %v1257_v16  ;;  %vm775_vm2 = vweird.f32 %v1257_v16  ;;  %s719_s19 = scalar_lea.vmem %s1710_s24, %s1543_s27  ;;  %895 = vmatpush.msra.mxu3 %v869_v52  ;;  %v902_v2 = vld [vmem:[%s1686_s11 + $0x8] sm:$0xff] }
  0x23   : > { %v1247_v11 = vld [vmem:[%s1709_s25] ss:$0 sm:$0xff]  ;;  %v1250_v60 = vld [vmem:[#allocation8] ss:$0 sm:$0xff]  ;;  %925 = vmatpush.msrb.mxu1 %v903_v1  ;;  %v1255_v29 = vld [vmem:[#allocation3] ss:$0 sm:$0xff] }
  0x24   : > { %756 = vmatpush.msra.mxu0 %v735_v4  ;;  %v772_v18 = vsub.f32 1.0, %v771_v17  ;;  %v729_v35 = vld [vmem:[%s719_s19] sm:$0xff]  ;;  %974 = vmatpush.msrb.mxu3 %v937_v54  ;;  %v991_v4 = vld [vmem:[%s1691_s16 + $0x18] sm:$0xff]  ;;  %s727_s19 = scalar_lea.vmem %s1695_s21, %s1543_s27 }
  0x25   : > { %1196 = vmatmul.msk.f32.vlgmr.msra.gmra.mxu1 %vm812_vm4, %v729_v35  ;;  %v938_v53 = vld [vmem:[%s1689_s14] sm:$0x3f] }
  0x26   : > { %757 = vmatpush.msra.mxu0 %v734_v5  ;;  %v773_v19 = vmul.f32 %v1257_v16, %v772_v18  ;;  %1200 = vmatpush.msk.msrb.mxu2 %vm816_vm3, %v938_v53  ;;  %v934_v57 = vld [vmem:[%s1688_s13] sm:$0xff]  ;;  %v990_v5 = vld [vmem:[%s1691_s16 + $0x10] sm:$0xff]  ;;  %v1023_v18 = vld [vmem:[%s1693_s18 + $0x18] sm:$0xff] }
  0x27   : > { %975 = vmatpush.msrb.mxu3 %v936_v55  ;;  %926 = vmatpush.msrb.mxu1 %v902_v2  ;;  %v901_v3 = vld [vmem:[%s1686_s11] sm:$0xff] }
  0x28   : > { %758 = vmatpush.msra.mxu0 %v733_v6  ;;  %v774_v20 = vadd.f32 %v1257_v16, %v773_v19  ;;  %v989_v6 = vld [vmem:[%s1691_s16 + $0x8] sm:$0xff]  ;;  %v1022_v19 = vld [vmem:[%s1693_s18 + $0x10] sm:$0xff] }
  0x29   : > { %976 = vmatpush.msrb.mxu3 %v935_v56  ;;  %927 = vmatpush.msrb.mxu1 %v901_v3 }
  0x2a   : > { %759 = vmatpush.msra.mxu0 %v732_v7  ;;  %v776_v21 = vsel %vm775_vm2, %v1257_v16, %v774_v20  ;;  %v988_v7 = vld [vmem:[%s1691_s16] sm:$0xff]  ;;  %v1021_v20 = vld [vmem:[%s1693_s18 + $0x8] sm:$0xff] }
  0x2b   : > { %977 = vmatpush.msrb.mxu3 %v934_v57  ;;  %1011 = vmatpush.msra.mxu1 %v991_v4 }
  0x2c   : > { %760 = vmatpush.msra.mxu0 %v731_v8  ;;  %v1251_v8 = vld [vmem:[%s1685_s10] ss:$0 sm:$0xff] }
  0x2d   : > { %1012 = vmatpush.msra.mxu1 %v990_v5 }
  0x2e   : > { %761 = vmatpush.msra.mxu0 %v730_v9 }
  0x2f   : > { %1194 = vmatmul.msk.f32.vlgmr.msra.gmra.mxu0 %vm742_vm0, %v728_v10  ;;  %1013 = vmatpush.msra.mxu1 %v989_v6 }
  0x30   : > { %1043 = vmatpush.msrb.mxu0 %v1023_v18 }
  0x31   : > { %1014 = vmatpush.msra.mxu1 %v988_v7 }
  0x32   : > { %1044 = vmatpush.msrb.mxu0 %v1022_v19 }
  0x34   : > { %1045 = vmatpush.msrb.mxu0 %v1021_v20 }
  0xa2   : > { %v837_v59 = vpop.f32.mrf.mxu1 }
  0xac   : > { %v763_v12 = vpop.f32.mrf.mxu0 }
  0xad   : > { %v764_v13 = vadd.f32 %v1247_v11, %v763_v12 }
  0xaf   : > { %v767_v14 = vsel %vm766_vm1, %v764_v13, 0.0 }
  0xb0   : > { %768 = vadd.xlane.f32.xlu0 %v767_v14 }
 0x123   : > { %v769_v22 = vpop.xlane.xlu0 %768 }
 0x124   : > { %v777_v23 = vmul.f32 %v776_v21, %v769_v22  ;;  %v1253_v22 = vld [vmem:[#allocation2] ss:$0 sm:$0xff] }
 0x126   : > { %v778_v24 = vsub.f32 %v764_v13, %v777_v23  ;;  %v1252_v13 = vld [vmem:[%s1690_s15] ss:$0 sm:$0xff] }
 0x128   : > { %v779_v25 = vmul.f32 %v778_v24, %v778_v24 }
 0x12a   : > { %v780_v26 = vsel %vm766_vm1, %v779_v25, 0.0  ;;  %v1254_v25 = vld [vmem:[%s1692_s17] ss:$0 sm:$0xff] }
 0x12b   : > { %781 = vadd.xlane.f32.xlu0 %v780_v26 }
 0x19e   : > { %v782_v30 = vpop.xlane.xlu0 %781 }
 0x19f   : > { %v783_v32 = vmul.f32 %v782_v30, %v776_v21  ;;  %v1020_v21 = vld [vmem:[%s1693_s18] sm:$0xff] }
 0x1a0   : > { %1046 = vmatpush.msrb.mxu0 %v1020_v21 }
 0x1a1   : > { %v784_v33 = vadd.f32 1e-05, %v783_v32 }
 0x1a3   : > { %1258 = vrsqrt.f32 %v784_v33  ;;  %vm791_vm6 = vweird.f32 %v784_v33 }
 0x1a9   : > { %v1259_v36 = vpop.eup %1258 }
 0x1aa   : > { %v786_v37 = vmul.f32 %v1259_v36, %v784_v33  ;;  %vm792_vm5 = vweird.f32 %v1259_v36 }
 0x1ab   : > { %vm793_vm7 = vmor %vm791_vm6, %vm792_vm5 }
 0x1ac   : > { %v787_v38 = vmul.f32 %v1259_v36, %v786_v37 }
 0x1ae   : > { %v788_v39 = vmul.f32 0.5, %v787_v38 }
 0x1b0   : > { %v789_v40 = vsub.f32 1.5, %v788_v39 }
 0x1b2   : > { %v790_v41 = vmul.f32 %v1259_v36, %v789_v40 }
 0x1b4   : > { %v794_v43 = vsel %vm793_vm7, %v1259_v36, %v790_v41 }
 0x1b5   : > { %v795_v45 = vmul.f32 %v794_v43, %v778_v24 }
 0x1b7   : > { %v800_v46 = vmul.f32 %v1248_v42, %v795_v45 }
 0x1b9   : > { %v805_v47 = vadd.f32 %v1249_v44, %v800_v46 }
 0x1bb   : > { %1260 = vtanh.f32 %v805_v47 }
 0x1c1   : > { %v1261_v48 = vpop.eup %1260 }
 0x1c2   : > { %1197 = vmatmul.msk.f32.vlgmr.msra.gmra.mxu2 %vm766_vm1, %v1261_v48 }
 0x1ca   : > { %1201 = vmatmul.msk.f32.vlgmr.msrb.gmra.mxu2 %vm812_vm4, %v729_v35 }
 0x245   : > { %v860_v61 = vpop.f32.mrf.mxu2 }
 0x246   : > { %v861_v62 = vadd.f32 %v860_v61, %v837_v59 }
 0x248   : > { %v867_v63 = vadd.f32 %v1250_v60, %v861_v62 }
 0x24a   : > { %v868_v0 = vmax.f32 %v867_v63, 0.0 }
 0x24c   : > { %1198 = vmatmul.msk.f32.vlgmr.msra.gmra.mxu3 %vm766_vm1, %v868_v0 }
 0x24d   : > { %v959_v12 = vpop.f32.mrf.mxu2 }
 0x254   : > { %1202 = vmatmul.msk.f32.vlgmr.msrb.gmra.mxu3 %vm766_vm1, %v1261_v48 }
 0x2cf   : > { %v897_v9 = vpop.f32.mrf.mxu3 }
 0x2d0   : > { %v898_v10 = vadd.f32 %v1251_v8, %v897_v9 }
 0x2d2   : > { %v900_v11 = vmax.f32 %v898_v10, 0.0 }
 0x2d4   : > { %1199 = vmatmul.msk.f32.vlgmr.msrb.gmra.mxu1 %vm766_vm1, %v900_v11 }
 0x2d7   : > { %v979_v14 = vpop.f32.mrf.mxu3 }
 0x2d8   : > { %v980_v15 = vadd.f32 %v979_v14, %v959_v12 }
 0x2da   : > { %v986_v16 = vadd.f32 %v1252_v13, %v980_v15 }
 0x2dc   : > { %v987_v17 = vmax.f32 %v986_v16, 0.0 }
 0x2de   : > { %1203 = vmatmul.msk.f32.vlgmr.msra.gmra.mxu1 %vm766_vm1, %v987_v17 }
 0x351   : > { %v929_v23 = vpop.f32.mrf.mxu1 }
 0x352   : > { %v930_v24 = vadd.f32 %v1253_v22, %v929_v23 }
 0x354   : > { %933 = vst.msk [vmem:[%s723_s4] sm:$0xff] %vm932_vm8, %v930_v24 }
 0x35b   : > { %v1016_v26 = vpop.f32.mrf.mxu1 }
 0x35c   : > { %v1017_v27 = vadd.f32 %v1254_v25, %v1016_v26 }
 0x35e   : > { %v1019_v28 = vmax.f32 %v1017_v27, 0.0 }
 0x360   : > { %1204 = vmatmul.msk.f32.vlgmr.msrb.gmra.mxu0 %vm766_vm1, %v1019_v28 }
 0x3dd   : > { %v1048_v30 = vpop.f32.mrf.mxu0 }
 0x3de   : > { %v1049_v31 = vadd.f32 %v1255_v29, %v1048_v30 }
 0x3e0   : > { %1051 = vst.msk [vmem:[%s727_s19] sm:$0xff] %vm932_vm8, %v1049_v31 }
 0x3e1 PF: > { %s38_s3 = sadd.s32 1, %s1366_s3  }
 0x3e2   : > { %p35_p7 = scmp.ge.s32.totalorder %s38_s3, 4  }
 0x3e4   :  { %37 = sbr.rel (!%p35_p7) target bundleno = 9 (0x9), region = 158 }
 0x3e9   :  { %1085 = vsyncpa [#allocation5], 1 }
 0x3ea   :  { %1087 = vsyncpa [#allocation5 + $0x1], 1 }
 0x3eb   :  { %1088 = vsyncpa [#allocation7], 1 }

</bundles_post_ra>
